<compile_context>
chip_gen: v7x
topology: tpu7x:2x2x1
jax: 0.10.0
libtpu: 0.0.40
codegen_flags: <defaults>
</compile_context>

<pallas_src>
import functools

import jax
import jax.numpy as jnp
import numpy as np
from jax.experimental import pallas as pl
from jax.experimental.pallas import tpu as pltpu


# --------------------- fused conv3x3 (+pre-BN/ReLU, +stats) ---------------------

def _conv3x3_kernel(x_ref, w_ref, mask_ref, sel_ref, sin_ref, bin_ref, bout_ref,
                    y_ref, sum_ref, ssq_ref, xpad_ref,
                    *, H, W, Cin, Cout, stride, apply_in_act, has_bias):
    """One batch element:
       [prev BN-affine + ReLU] -> 3x3 conv (pad=1, stride) -> [+bias],
       plus per-channel sum / sum-of-squares for the *following* BatchNorm."""
    HW = H * W

    x = x_ref[0]                                       # (Cin, H*W) f32
    if apply_in_act:
        # previous layer's BN affine + ReLU, fused into this conv's input path
        x = jnp.maximum(x * sin_ref[...] + bin_ref[...], 0.0)

    # Zero-padded image as a flat, row-padded VMEM buffer:
    #   xpad[c, 1 + r*W + col] = padded_image[c, r, col]   (rows 0 and H+1 zero)
    # Tap (kh, kw) of the 3x3 stencil is the contiguous lane slice
    #   xpad[:, kh*W + kw : kh*W + kw + H*W]
    # with the left/right image borders fixed up by the 0/1 lane masks.
    xpad_ref[...] = jnp.zeros_like(xpad_ref)
    xpad_ref[:, W + 1:W + 1 + HW] = x

    m_left = mask_ref[0:1, :]                          # zero where out-col == 0
    m_right = mask_ref[1:2, :]                         # zero where out-col == W-1

    taps = []
    for kh in range(3):
        for kw in range(3):
            t = xpad_ref[:, kh * W + kw:kh * W + kw + HW]   # (Cin, H*W)
            if kw == 0:
                t = t * m_left
            elif kw == 2:
                t = t * m_right
            taps.append(t)

    # im2col patch -> a single MXU matmul with K = 9*Cin (bf16 in, f32 accumulate)
    patch = jnp.concatenate(taps, axis=0).astype(jnp.bfloat16)      # (9*Cin, H*W)
    if stride > 1:
        # exact 0/1 selection matmul: keep only the strided output pixels
        patch = jnp.dot(patch, sel_ref[...],
                        preferred_element_type=jnp.float32).astype(jnp.bfloat16)
    acc = jnp.dot(w_ref[...], patch,
                  preferred_element_type=jnp.float32)               # (Cout, Ho*Wo)
    if has_bias:
        acc = acc + bout_ref[...]

    y_ref[0] = acc
    # per-channel batch-stats contributions consumed by the next BatchNorm
    sum_ref[0] = jnp.sum(acc, axis=1, keepdims=True)
    ssq_ref[0] = jnp.sum(acc * acc, axis=1, keepdims=True)


def conv3x3(xf, w_hwio, H, W, stride=1, in_scale=None, in_bias=None, out_bias=None):
    """3x3 conv, padding=1, optional stride, optional fused input BN-affine+ReLU.

    xf: (N, Cin, H*W) f32;  w_hwio: (3, 3, Cin, Cout).
    Returns (y (N, Cout, Ho*Wo) f32, per-image channel sums (N, Cout), sumsq (N, Cout)).
    """
    N, Cin, HW = xf.shape
    assert HW == H * W and H % stride == 0 and W % stride == 0
    Cout = w_hwio.shape[-1]
    Ho, Wo = H // stride, W // stride
    HWo = Ho * Wo
    L = (H + 2) * W + 2                    # flat row-padded buffer length

    # (Cout, 9*Cin) weight with (kh, kw, cin) minor order; bf16 for the MXU
    wflat = jnp.transpose(w_hwio, (3, 0, 1, 2)).reshape(Cout, 9 * Cin).astype(jnp.bfloat16)

    col = np.arange(HW) % W
    mask = jnp.asarray(np.stack([(col != 0), (col != W - 1)]).astype(np.float32))  # (2, H*W)

    if stride > 1:
        sel_np = np.zeros((HW, HWo), np.float32)
        oh, ow = np.meshgrid(np.arange(Ho), np.arange(Wo), indexing="ij")
        sel_np[(stride * oh * W + stride * ow).ravel(), np.arange(HWo)] = 1.0
        sel = jnp.asarray(sel_np).astype(jnp.bfloat16)
    else:
        sel = jnp.zeros((1, 1), jnp.bfloat16)          # unused dummy

    apply_in_act = in_scale is not None
    has_bias = out_bias is not None
    sin = (in_scale if apply_in_act else jnp.ones((Cin,), jnp.float32))
    sin = sin.reshape(Cin, 1).astype(jnp.float32)
    bin_ = (in_bias if apply_in_act else jnp.zeros((Cin,), jnp.float32))
    bin_ = bin_.reshape(Cin, 1).astype(jnp.float32)
    bout = (out_bias if has_bias else jnp.zeros((Cout,), jnp.float32))
    bout = bout.reshape(Cout, 1).astype(jnp.float32)

    kernel = functools.partial(
        _conv3x3_kernel, H=H, W=W, Cin=Cin, Cout=Cout, stride=stride,
        apply_in_act=apply_in_act, has_bias=has_bias)

    y, s, q = pl.pallas_call(
        kernel,
        out_shape=(jax.ShapeDtypeStruct((N, Cout, HWo), jnp.float32),
                   jax.ShapeDtypeStruct((N, Cout, 1), jnp.float32),
                   jax.ShapeDtypeStruct((N, Cout, 1), jnp.float32)),
        grid_spec=pltpu.PrefetchScalarGridSpec(
            num_scalar_prefetch=0,
            grid=(N,),
            in_specs=[
                pl.BlockSpec((1, Cin, HW), lambda n: (n, 0, 0)),
                pl.BlockSpec((Cout, 9 * Cin), lambda n: (0, 0)),
                pl.BlockSpec((2, HW), lambda n: (0, 0)),
                pl.BlockSpec(sel.shape, lambda n: (0, 0)),
                pl.BlockSpec((Cin, 1), lambda n: (0, 0)),
                pl.BlockSpec((Cin, 1), lambda n: (0, 0)),
                pl.BlockSpec((Cout, 1), lambda n: (0, 0)),
            ],
            out_specs=[
                pl.BlockSpec((1, Cout, HWo), lambda n: (n, 0, 0)),
                pl.BlockSpec((1, Cout, 1), lambda n: (n, 0, 0)),
                pl.BlockSpec((1, Cout, 1), lambda n: (n, 0, 0)),
            ],
            scratch_shapes=[pltpu.VMEM((Cin, L), jnp.float32)],
        ),
        compiler_params=pltpu.CompilerParams(dimension_semantics=("parallel",)),
    )(xf.astype(jnp.float32), wflat, mask, sel, sin, bin_, bout)
    return y, s[..., 0], q[..., 0]


# ------------------ final fused BN-affine + ReLU + residual add ------------------

def _bn_relu_add_kernel(y_ref, s_ref, b_ref, r_ref, o_ref):
    o_ref[0] = jnp.maximum(y_ref[0] * s_ref[...] + b_ref[...], 0.0) + r_ref[0]


def bn_relu_add(y, scale, bias, resid):
    """out = relu(y * scale + bias) + resid, all (N, C, H*W) in HBM."""
    N, C, HW = y.shape
    s2 = scale.reshape(C, 1).astype(jnp.float32)
    b2 = bias.reshape(C, 1).astype(jnp.float32)
    return pl.pallas_call(
        _bn_relu_add_kernel,
        out_shape=jax.ShapeDtypeStruct((N, C, HW), jnp.float32),
        grid_spec=pltpu.PrefetchScalarGridSpec(
            num_scalar_prefetch=0,
            grid=(N,),
            in_specs=[pl.BlockSpec((1, C, HW), lambda n: (n, 0, 0)),
                      pl.BlockSpec((C, 1), lambda n: (0, 0)),
                      pl.BlockSpec((C, 1), lambda n: (0, 0)),
                      pl.BlockSpec((1, C, HW), lambda n: (n, 0, 0))],
            out_specs=pl.BlockSpec((1, C, HW), lambda n: (n, 0, 0)),
        ),
        compiler_params=pltpu.CompilerParams(dimension_semantics=("parallel",)),
    )(y, s2, b2, resid.astype(jnp.float32))


# --------------------------- BN affine from fused stats --------------------------

def _bn_scale_bias(sum_nc, ssq_nc, count, gamma, beta, eps=1e-5):
    """Finish E[x^2]-E[x]^2 on C-length vectors (tiny XLA glue)."""
    s = jnp.sum(sum_nc, axis=0)
    q = jnp.sum(ssq_nc, axis=0)
    mean = s / count
    var = jnp.maximum(q / count - mean * mean, 0.0)    # biased, as PyTorch normalizes
    scale = gamma * jax.lax.rsqrt(var + eps)
    bias = beta - mean * scale
    return scale, bias


# ----------------------------------- BlockLayer ----------------------------------

def block_layer_forward(x, p, in_ch, out_ch, stride=1):
    """x: (N, in_ch, H, W) f32 (PyTorch NCHW).  Returns (N, out_ch, Ho, Wo)."""
    N, Cin, H, W = x.shape
    assert Cin == in_ch
    Ho, Wo = H // stride, W // stride
    xf = x.reshape(N, Cin, H * W).astype(jnp.float32)

    # conv1 (no bias) + fused bn1 batch-stats
    y1, s1, q1 = conv3x3(xf, p["w1"], H, W)
    sc1, sh1 = _bn_scale_bias(s1, q1, N * H * W, p["g1"], p["b1"])

    # bn1+relu1 fused into conv2's input path; stride applied in-kernel
    y2, s2, q2 = conv3x3(y1, p["w2"], H, W, stride=stride, in_scale=sc1, in_bias=sh1)
    sc2, sh2 = _bn_scale_bias(s2, q2, N * Ho * Wo, p["g2"], p["b2"])

    # bn2+relu2 fused into conv3's input path
    y3, s3, q3 = conv3x3(y2, p["w3"], Ho, Wo, in_scale=sc2, in_bias=sh2)
    sc3, sh3 = _bn_scale_bias(s3, q3, N * Ho * Wo, p["g3"], p["b3"])

    # shortcut: identity or strided conv (with bias, no BN)
    if in_ch == out_ch and stride == 1:
        r = xf
    else:
        r, _, _ = conv3x3(xf, p["ws"], H, W, stride=stride, out_bias=p["bs"])

    # relu3(bn3(conv3)) + shortcut   (matches the PyTorch module: add AFTER relu3)
    out = bn_relu_add(y3, sc3, sh3, r)                 # (N, out_ch, Ho*Wo)
    return out.reshape(N, out_ch, Ho, Wo)


# ------------------------------- pure-JAX reference ------------------------------

def _ref_conv(x, w, b=None, stride=1):
    # mirrors the kernel's MXU numerics: bf16 operands, f32 accumulation
    y = jax.lax.conv_general_dilated(
        x.astype(jnp.bfloat16), w.astype(jnp.bfloat16),
        window_strides=(stride, stride), padding=((1, 1), (1, 1)),
        dimension_numbers=("NCHW", "HWIO", "NCHW"),
        preferred_element_type=jnp.float32)
    if b is not None:
        y = y + b.reshape(1, -1, 1, 1)
    return y


def _ref_bn_relu(y, gamma, beta, eps=1e-5):
    mean = jnp.mean(y, axis=(0, 2, 3), keepdims=True)
    var = jnp.mean((y - mean) ** 2, axis=(0, 2, 3), keepdims=True)
    yhat = (y - mean) * jax.lax.rsqrt(var + eps)
    return jnp.maximum(yhat * gamma.reshape(1, -1, 1, 1) + beta.reshape(1, -1, 1, 1), 0.0)


def ref_forward(x, p, in_ch, out_ch, stride):
    z1 = _ref_bn_relu(_ref_conv(x, p["w1"]), p["g1"], p["b1"])
    z2 = _ref_bn_relu(_ref_conv(z1, p["w2"], stride=stride), p["g2"], p["b2"])
    z3 = _ref_bn_relu(_ref_conv(z2, p["w3"]), p["g3"], p["b3"])
    if in_ch == out_ch and stride == 1:
        r = x
    else:
        r = _ref_conv(x, p["ws"], p["bs"], stride=stride)
    return z3 + r


# ------------------------------------- main ---------------------------------------

def _make_params(key, in_ch, out_ch):
    hid = out_ch // 4
    ks = jax.random.split(key, 11)
    r = lambda k, shape: 0.1 * jax.random.normal(k, shape, jnp.float32)
    return {
        "w1": r(ks[0], (3, 3, in_ch, hid)),
        "g1": 1.0 + r(ks[1], (hid,)), "b1": r(ks[2], (hid,)),
        "w2": r(ks[3], (3, 3, hid, hid)),
        "g2": 1.0 + r(ks[4], (hid,)), "b2": r(ks[5], (hid,)),
        "w3": r(ks[6], (3, 3, hid, out_ch)),
        "g3": 1.0 + r(ks[7], (out_ch,)), "b3": r(ks[8], (out_ch,)),
        "ws": r(ks[9], (3, 3, in_ch, out_ch)),
        "bs": r(ks[10], (out_ch,)),
    }


if __name__ == "__main__":
    # TODO(synk): BatchNorm running_mean/running_var updates (training-time state
    # side effect with no impact on the forward output) are not modeled.
    key = jax.random.PRNGKey(0)
    N, S = 2, 16

    # config 0: conv shortcut with stride 2; config 1: identity shortcut
    for cfg_i, (in_ch, out_ch, stride) in enumerate([(8, 16, 2), (16, 16, 1)]):
        kx, kp = jax.random.split(jax.random.fold_in(key, cfg_i))
        x = jax.random.normal(kx, (N, in_ch, S, S), jnp.float32)   # NCHW, like PyTorch
        params = _make_params(kp, in_ch, out_ch)

        out = jax.block_until_ready(block_layer_forward(x, params, in_ch, out_ch, stride))
        ref = jax.block_until_ready(ref_forward(x, params, in_ch, out_ch, stride))

        assert out.shape == ref.shape, (out.shape, ref.shape)
        max_err = float(np.max(np.abs(np.asarray(out) - np.asarray(ref))))
        assert np.allclose(np.asarray(out), np.asarray(ref), rtol=2e-2, atol=2e-2), max_err

    print("KERNEL_OK")
</pallas_src>

<mosaic_0001>
module attributes {stable_mosaic.version = 11 : i64} {
  func.func @_conv3x3_kernel(%arg0: i32, %arg1: memref<1x8x256xf32, #tpu.memory_space<vmem>>, %arg2: memref<4x72xbf16, #tpu.memory_space<vmem>>, %arg3: memref<2x256xf32, #tpu.memory_space<vmem>>, %arg4: memref<1x1xbf16, #tpu.memory_space<vmem>>, %arg5: memref<8x1xf32, #tpu.memory_space<vmem>>, %arg6: memref<8x1xf32, #tpu.memory_space<vmem>>, %arg7: memref<4x1xf32, #tpu.memory_space<vmem>>, %arg8: memref<1x4x256xf32, #tpu.memory_space<vmem>>, %arg9: memref<1x4x1xf32, #tpu.memory_space<vmem>>, %arg10: memref<1x4x1xf32, #tpu.memory_space<vmem>>, %arg11: memref<8x290xf32, #tpu.memory_space<vmem>>) attributes {dimension_semantics = [#tpu.dimension_semantics<parallel>], iteration_bounds = array<i64: 2>, scalar_prefetch = 0 : i64, scratch_operands = 1 : i64, tpu.core_type = #tpu.core_type<tc>, window_params = [{transform_indices = @transform_0, window_bounds = array<i64: 1, 8, 256>}, {pipeline_mode = #tpu.pipeline_mode<synchronous>, transform_indices = @transform_1, window_bounds = array<i64: 4, 72>}, {pipeline_mode = #tpu.pipeline_mode<synchronous>, transform_indices = @transform_2, window_bounds = array<i64: 2, 256>}, {pipeline_mode = #tpu.pipeline_mode<synchronous>, transform_indices = @transform_3, window_bounds = array<i64: 1, 1>}, {pipeline_mode = #tpu.pipeline_mode<synchronous>, transform_indices = @transform_4, window_bounds = array<i64: 8, 1>}, {pipeline_mode = #tpu.pipeline_mode<synchronous>, transform_indices = @transform_5, window_bounds = array<i64: 8, 1>}, {pipeline_mode = #tpu.pipeline_mode<synchronous>, transform_indices = @transform_6, window_bounds = array<i64: 4, 1>}, {transform_indices = @transform_7, window_bounds = array<i64: 1, 4, 256>}, {transform_indices = @transform_8, window_bounds = array<i64: 1, 4, 1>}, {transform_indices = @transform_9, window_bounds = array<i64: 1, 4, 1>}]} {
    %c0 = arith.constant 0 : index
    %c0_0 = arith.constant 0 : index
    %c0_1 = arith.constant 0 : index
    %0 = vector.load %arg1[%c0, %c0_0, %c0_1] : memref<1x8x256xf32, #tpu.memory_space<vmem>>, vector<1x8x256xf32>
    %1 = vector.shape_cast %0 : vector<1x8x256xf32> to vector<8x256xf32>
    %cst = arith.constant 0.000000e+00 : f32
    %2 = vector.broadcast %cst : f32 to vector<8x290xf32>
    %c0_2 = arith.constant 0 : index
    %c0_3 = arith.constant 0 : index
    %3 = vector.load %arg11[%c0_2, %c0_3] : memref<8x290xf32, #tpu.memory_space<vmem>>, vector<8x290xf32>
    tpu.vector_store %arg11[%c0_2, %c0_3], %2 {strides = array<i32>} : memref<8x290xf32, #tpu.memory_space<vmem>>, vector<8x290xf32>,
    %c0_4 = arith.constant 0 : index
    %c17 = arith.constant 17 : index
    %4 = vector.load %arg11[%c0_4, %c17] : memref<8x290xf32, #tpu.memory_space<vmem>>, vector<8x256xf32>
    tpu.vector_store %arg11[%c0_4, %c17], %1 {strides = array<i32>} : memref<8x290xf32, #tpu.memory_space<vmem>>, vector<8x256xf32>,
    %c0_5 = arith.constant 0 : index
    %c0_6 = arith.constant 0 : index
    %5 = vector.load %arg3[%c0_5, %c0_6] : memref<2x256xf32, #tpu.memory_space<vmem>>, vector<1x256xf32>
    %c1 = arith.constant 1 : index
    %c0_7 = arith.constant 0 : index
    %6 = vector.load %arg3[%c1, %c0_7] : memref<2x256xf32, #tpu.memory_space<vmem>>, vector<1x256xf32>
    %c0_8 = arith.constant 0 : index
    %c0_9 = arith.constant 0 : index
    %7 = vector.load %arg11[%c0_8, %c0_9] : memref<8x290xf32, #tpu.memory_space<vmem>>, vector<8x256xf32>
    %8 = vector.broadcast %5 : vector<1x256xf32> to vector<8x256xf32>
    %9 = arith.mulf %7, %8 : vector<8x256xf32>
    %c0_10 = arith.constant 0 : index
    %c1_11 = arith.constant 1 : index
    %10 = vector.load %arg11[%c0_10, %c1_11] : memref<8x290xf32, #tpu.memory_space<vmem>>, vector<8x256xf32>
    %c0_12 = arith.constant 0 : index
    %c2 = arith.constant 2 : index
    %11 = vector.load %arg11[%c0_12, %c2] : memref<8x290xf32, #tpu.memory_space<vmem>>, vector<8x256xf32>
    %12 = vector.broadcast %6 : vector<1x256xf32> to vector<8x256xf32>
    %13 = arith.mulf %11, %12 : vector<8x256xf32>
    %c0_13 = arith.constant 0 : index
    %c16 = arith.constant 16 : index
    %14 = vector.load %arg11[%c0_13, %c16] : memref<8x290xf32, #tpu.memory_space<vmem>>, vector<8x256xf32>
    %15 = vector.broadcast %5 : vector<1x256xf32> to vector<8x256xf32>
    %16 = arith.mulf %14, %15 : vector<8x256xf32>
    %c0_14 = arith.constant 0 : index
    %c17_15 = arith.constant 17 : index
    %17 = vector.load %arg11[%c0_14, %c17_15] : memref<8x290xf32, #tpu.memory_space<vmem>>, vector<8x256xf32>
    %c0_16 = arith.constant 0 : index
    %c18 = arith.constant 18 : index
    %18 = vector.load %arg11[%c0_16, %c18] : memref<8x290xf32, #tpu.memory_space<vmem>>, vector<8x256xf32>
    %19 = vector.broadcast %6 : vector<1x256xf32> to vector<8x256xf32>
    %20 = arith.mulf %18, %19 : vector<8x256xf32>
    %c0_17 = arith.constant 0 : index
    %c32 = arith.constant 32 : index
    %21 = vector.load %arg11[%c0_17, %c32] : memref<8x290xf32, #tpu.memory_space<vmem>>, vector<8x256xf32>
    %22 = vector.broadcast %5 : vector<1x256xf32> to vector<8x256xf32>
    %23 = arith.mulf %21, %22 : vector<8x256xf32>
    %c0_18 = arith.constant 0 : index
    %c33 = arith.constant 33 : index
    %24 = vector.load %arg11[%c0_18, %c33] : memref<8x290xf32, #tpu.memory_space<vmem>>, vector<8x256xf32>
    %c0_19 = arith.constant 0 : index
    %c34 = arith.constant 34 : index
    %25 = vector.load %arg11[%c0_19, %c34] : memref<8x290xf32, #tpu.memory_space<vmem>>, vector<8x256xf32>
    %26 = vector.broadcast %6 : vector<1x256xf32> to vector<8x256xf32>
    %27 = arith.mulf %25, %26 : vector<8x256xf32>
    %28 = tpu.concatenate %9, %10, %13, %16, %17, %20, %23, %24, %27 in 0 : vector<8x256xf32>, vector<8x256xf32>, vector<8x256xf32>, vector<8x256xf32>, vector<8x256xf32>, vector<8x256xf32>, vector<8x256xf32>, vector<8x256xf32>, vector<8x256xf32> -> vector<72x256xf32>
    %29 = arith.truncf %28 : vector<72x256xf32> to vector<72x256xbf16>
    %c0_20 = arith.constant 0 : index
    %c0_21 = arith.constant 0 : index
    %30 = vector.load %arg2[%c0_20, %c0_21] : memref<4x72xbf16, #tpu.memory_space<vmem>>, vector<4x72xbf16>
    %cst_22 = arith.constant dense<0.000000e+00> : vector<4x256xf32>
    %31 = tpu.matmul %30, %29, %cst_22 {dimension_numbers = #tpu.dot_dimension_numbers<[1], [0], [0], [1], [0, 0, 1, 1], [], []>} : vector<4x72xbf16>, vector<72x256xbf16>, vector<4x256xf32> -> vector<4x256xf32>
    %c0_23 = arith.constant 0 : index
    %c0_24 = arith.constant 0 : index
    %c0_25 = arith.constant 0 : index
    %32 = vector.load %arg8[%c0_23, %c0_24, %c0_25] : memref<1x4x256xf32, #tpu.memory_space<vmem>>, vector<1x4x256xf32>
    %33 = vector.shape_cast %32 : vector<1x4x256xf32> to vector<4x256xf32>
    %34 = vector.shape_cast %31 : vector<4x256xf32> to vector<1x4x256xf32>
    tpu.vector_store %arg8[%c0_23, %c0_24, %c0_25], %34 {strides = array<i32>} : memref<1x4x256xf32, #tpu.memory_space<vmem>>, vector<1x4x256xf32>,
    %cst_26 = arith.constant dense<0.000000e+00> : vector<4xf32>
    %35 = vector.multi_reduction <add>, %31, %cst_26 [1] : vector<4x256xf32> to vector<4xf32>
    %36 = vector.shape_cast %35 : vector<4xf32> to vector<4x1xf32>
    %c0_27 = arith.constant 0 : index
    %c0_28 = arith.constant 0 : index
    %c0_29 = arith.constant 0 : index
    %37 = vector.load %arg9[%c0_27, %c0_28, %c0_29] : memref<1x4x1xf32, #tpu.memory_space<vmem>>, vector<1x4x1xf32>
    %38 = vector.shape_cast %37 : vector<1x4x1xf32> to vector<4x1xf32>
    %39 = vector.shape_cast %36 : vector<4x1xf32> to vector<1x4x1xf32>
    tpu.vector_store %arg9[%c0_27, %c0_28, %c0_29], %39 {strides = array<i32>} : memref<1x4x1xf32, #tpu.memory_space<vmem>>, vector<1x4x1xf32>,
    %40 = arith.mulf %31, %31 : vector<4x256xf32>
    %cst_30 = arith.constant dense<0.000000e+00> : vector<4xf32>
    %41 = vector.multi_reduction <add>, %40, %cst_30 [1] : vector<4x256xf32> to vector<4xf32>
    %42 = vector.shape_cast %41 : vector<4xf32> to vector<4x1xf32>
    %c0_31 = arith.constant 0 : index
    %c0_32 = arith.constant 0 : index
    %c0_33 = arith.constant 0 : index
    %43 = vector.load %arg10[%c0_31, %c0_32, %c0_33] : memref<1x4x1xf32, #tpu.memory_space<vmem>>, vector<1x4x1xf32>
    %44 = vector.shape_cast %43 : vector<1x4x1xf32> to vector<4x1xf32>
    %45 = vector.shape_cast %42 : vector<4x1xf32> to vector<1x4x1xf32>
    tpu.vector_store %arg10[%c0_31, %c0_32, %c0_33], %45 {strides = array<i32>} : memref<1x4x1xf32, #tpu.memory_space<vmem>>, vector<1x4x1xf32>,
    return
  }
  func.func @transform_0(%arg0: i32) -> (i32, i32, i32) {
    %c0_i32 = arith.constant 0 : i32
    %c0_i32_0 = arith.constant 0 : i32
    %c0_i32_1 = arith.constant 0 : i32
    return %arg0, %c0_i32, %c0_i32_0 : i32, i32, i32
  }
  func.func @transform_1(%arg0: i32) -> (i32, i32) {
    %c0_i32 = arith.constant 0 : i32
    %c0_i32_0 = arith.constant 0 : i32
    %c0_i32_1 = arith.constant 0 : i32
    return %c0_i32, %c0_i32_0 : i32, i32
  }
  func.func @transform_2(%arg0: i32) -> (i32, i32) {
    %c0_i32 = arith.constant 0 : i32
    %c0_i32_0 = arith.constant 0 : i32
    %c0_i32_1 = arith.constant 0 : i32
    return %c0_i32, %c0_i32_0 : i32, i32
  }
  func.func @transform_3(%arg0: i32) -> (i32, i32) {
    %c0_i32 = arith.constant 0 : i32
    %c0_i32_0 = arith.constant 0 : i32
    %c0_i32_1 = arith.constant 0 : i32
    return %c0_i32, %c0_i32_0 : i32, i32
  }
  func.func @transform_4(%arg0: i32) -> (i32, i32) {
    %c0_i32 = arith.constant 0 : i32
    %c0_i32_0 = arith.constant 0 : i32
    %c0_i32_1 = arith.constant 0 : i32
    return %c0_i32, %c0_i32_0 : i32, i32
  }
  func.func @transform_5(%arg0: i32) -> (i32, i32) {
    %c0_i32 = arith.constant 0 : i32
    %c0_i32_0 = arith.constant 0 : i32
    %c0_i32_1 = arith.constant 0 : i32
    return %c0_i32, %c0_i32_0 : i32, i32
  }
  func.func @transform_6(%arg0: i32) -> (i32, i32) {
    %c0_i32 = arith.constant 0 : i32
    %c0_i32_0 = arith.constant 0 : i32
    %c0_i32_1 = arith.constant 0 : i32
    return %c0_i32, %c0_i32_0 : i32, i32
  }
  func.func @transform_7(%arg0: i32) -> (i32, i32, i32) {
    %c0_i32 = arith.constant 0 : i32
    %c0_i32_0 = arith.constant 0 : i32
    %c0_i32_1 = arith.constant 0 : i32
    return %arg0, %c0_i32, %c0_i32_0 : i32, i32, i32
  }
  func.func @transform_8(%arg0: i32) -> (i32, i32, i32) {
    %c0_i32 = arith.constant 0 : i32
    %c0_i32_0 = arith.constant 0 : i32
    %c0_i32_1 = arith.constant 0 : i32
    return %arg0, %c0_i32, %c0_i32_0 : i32, i32, i32
  }
  func.func @transform_9(%arg0: i32) -> (i32, i32, i32) {
    %c0_i32 = arith.constant 0 : i32
    %c0_i32_0 = arith.constant 0 : i32
    %c0_i32_1 = arith.constant 0 : i32
    return %arg0, %c0_i32, %c0_i32_0 : i32, i32, i32
  }
}

</mosaic_0001>

<bundles_post_ra>
// kernel: tpu_custom_call.1
= control target key start
LH: loop header
LB: loop body
LE: loop exit
PB: predicated region body
PF: predicated region fallthrough
CT: control target
= control target key end

     0   :  { %17 = vsyncpa [#allocation5], 0  ;;  %s1319_s0 = inlined_call_operand.hbm [shape: f32[2,8,256], index: 0, kind: input, shape index: {}]   ;;  %s1320_s1 = inlined_call_operand.vmem [shape: bf16[4,72], index: 1, kind: input, shape index: {}]   ;;  %s1321_s2 = inlined_call_operand.vmem [shape: f32[2,256], index: 2, kind: input, shape index: {}]   ;;  %s1322_s3 = inlined_call_operand.<no memory space> [shape: bf16[1,1], index: 3, kind: input, shape index: {}]   ;;  %s1323_s4 = inlined_call_operand.vmem [shape: f32[8,1], index: 4, kind: input, shape index: {}]   ;;  %s1324_s5 = inlined_call_operand.vmem [shape: f32[8,1], index: 5, kind: input, shape index: {}]   ;;  %s1325_s6 = inlined_call_operand.vmem [shape: f32[4,1], index: 6, kind: input, shape index: {}]   ;;  %s1326_s7 = inlined_call_operand.hbm [shape: f32[2,4,256], index: 7, kind: output, shape index: {0}]   ;;  %s1327_s8 = inlined_call_operand.vmem [shape: f32[2,4,1], index: 8, kind: output, shape index: {1}]   ;;  %s1328_s9 = inlined_call_operand.vmem [shape: f32[2,4,1], index: 9, kind: output, shape index: {2}]  }
   0x1   :  { %19 = vsyncpa [#allocation5 + $0x1], 0 }
   0x2   :  { %20 = vsyncpa [#allocation6], 0 }
   0x3   :  { %22 = vsyncpa [#allocation6 + $0x1], 0  ;;  %s1106_s3 = smov 0   ;;  %s1108_s4 = smov 0  }
   0x4   :  { %s1110_s5 = smov 0   ;;  %s1112_s6 = smov 0  }
   0x5 LB: > { %s1127_s30 = sadd.s32 4294967295, %s1036_s6   ;;  %s817_s10 = sadd.s32 4294967294, %s1036_s6   ;;  %s1036_s6 = sphi %s1112_s6, %s1343_s6   ;;  %s1032_s5 = sphi %s1110_s5, %s1342_s5   ;;  %s1028_s4 = sphi %s1108_s4, %s1341_s4   ;;  %s1024_s3 = sphi %s1106_s3, %s1340_s3  }
   0x6   : > { %s1131_s11 = sadd.s32 1, %s1036_s6   ;;  %s35_s12 = sadd.s32 1, %s1032_s5 }
   0x7   : > { %s32_s13 = ssub.s32 %s1036_s6, %s1131_s11  ;;  %p42_p0 = scmp.ne.s32.totalorder %s1032_s5, %s1028_s4 }
   0x8   : > { %p33_p1 = scmp.eq.s32.totalorder %s32_s13, 0  ;;  %p43_p2 = scmp.eq.s32.totalorder %s1036_s6, 0 }
   0x9   : > { %p48_p3 = scmp.ne.s32.totalorder %s1028_s4, %s1024_s3  ;;  %p49_p4 = scmp.eq.s32.totalorder %s1127_s30, 0 }
   0xa   : > { %s1143_s14 = scalar_select %p33_p1, %s1032_s5, %s35_s12  }
   0xb   : > { %p1145_p5 = por %p43_p2, %p42_p0  ;;  %p1149_p6 = por %p49_p4, %p48_p3 }
   0xc   : > { %p198_p7 = scmp.eq.s32.totalorder %s1127_s30, 1  ;;  %p204_p8 = scmp.eq.s32.totalorder %s817_s10, 1 }
   0xd   : > { %p850_p10 = scmp.lt.s32.totalorder %s1036_s6, 2  ;;  %s294_s19 = sand.u32 1, %s1032_s5  }
   0xe   : > { %p1156_p11 = por %p198_p7, %p42_p0  ;;  %p1160_p12 = por %p204_p8, %p48_p3 }
   0xf   : > { %s836_s20 = sshll.u32 %s1036_s6, 8  ;;  %s820_s21 = sshll.u32 %s294_s19, 4 }
  0x10   : > { %s1332_s17 = scalar_select %p1156_p11, 1, 0 }
  0x11   : > { %s1333_s18 = scalar_select %p1160_p12, 1, 0 }
  0x12   : > { %s1169_s24 = scalar_lea.hbm %s1319_s0, %s836_s20  ;;  %s298_s25 = scalar_lea.vmem [#allocation4], %s820_s21 }
  0x13   : > { %s306_s26 = sshll.u32 %s298_s25, 4  ;;  %p1173_p13 = pnand %p850_p10, %p1145_p5  ;;  %s1177_s26 = int_to_ptr.vmem [resolvable:$true] %s306_s26 }
  0x14   : > { %s295_s28 = scalar_lea.sflag [#allocation5], %s294_s19  ;;  %s940_s29 = scalar_lea.hbm %s1169_s24, 256 }
  0x15   : > { %p941_p2 = scmp.ne.s32.totalorder %s1169_s24, %s940_s29  ;;  %p942_p3 = pneg %p1173_p13 }
  0x16   : > { %s945_s13 = scalar_lea.hbm %s1319_s0, 512  ;;  %p946_p5 = scmp.lt.u32.totalorder %s1169_s24, %s1319_s0 }
  0x17   : > { %p943_p4 = pnand %p942_p3, %p941_p2  ;;  %p947_p8 = scmp.lt.u32.totalorder %s945_s13, %s940_s29 }
  0x18   : > { %p949_p9 = scmp.lt.u32.totalorder %s940_s29, %s1169_s24 }
  0x19   : > { %p944_p7 = pneg %p943_p4  ;;  %p948_p10 = por %p947_p8, %p946_p5 }
  0x1b   : > { %p950_p0 = por %p949_p9, %p948_p10 }
  0x1d   : > { %p951_p1 = pnand %p950_p0, %p944_p7 }
  0x1f   : > { %954 = shalt.err (!%p951_p1)
}
  0x20   : > { %s955_s19 = scalar_lea.vmem %s1177_s26, 256  ;;  %s1038_s21 = smov [#allocation4]  }
  0x21   : > { %p956_p2 = scmp.ne.s32.totalorder %s1177_s26, %s955_s19  ;;  %s960_s22 = sshll.u32 %s1038_s21, 4  ;;  %s961_s22 = int_to_ptr.vmem [resolvable:$false] %s960_s22 }
  0x22   : > { %s962_s23 = scalar_lea.vmem %s961_s22, 512  ;;  %p963_p11 = scmp.lt.s32.totalorder %s1177_s26, %s961_s22 }
  0x23   : > { %p958_p4 = pnand %p956_p2, %p942_p3  ;;  %p964_p5 = scmp.lt.s32.totalorder %s962_s23, %s955_s19 }
  0x25   : > { %p959_p12 = pneg %p958_p4  ;;  %p965_p8 = por %p964_p5, %p963_p11 }
  0x27   : > { %p966_p9 = pnand %p965_p8, %p959_p12 }
  0x29   : > { %969 = shalt.err (!%p966_p9)
}
  0x2a   : > { %845 = dma.hbm_to_vmem [thread:$0]  (!%p1173_p13), %s1169_s24, 256, %s1177_s26, %s295_s28  }
  0x2b   : > { %p1335_p0 = scmp.lt.s32.totalorder %s1036_s6, 3  ;;  %p1336_p1 = scmp.ge.s32.totalorder %s1036_s6, 1 }
  0x2d   : > { %p312_p3 = pnand %p1336_p1, %p1335_p0 }
  0x2e   : > { %s1211_s25 = sand.u32 (!%p312_p3), 1, %s1028_s4  }
  0x2f   : > { %315 = sbr.rel (%p312_p3) target bundleno = 694 (0x2b6), region = 48  ;;  %s824_s29 = sshll.u32 (!%p312_p3), %s1211_s25, 4 }
  0x30   : > { %s318_s10 = scalar_lea.sflag (!%p312_p3), [#allocation5], %s1211_s25  ;;  %s321_s12 = scalar_lea.vmem (!%p312_p3), [#allocation4], %s824_s29 }
  0x36   : > { %1015 = dma.done.wait (%p1149_p6), %s318_s10, 256  }
  0x37   : > { %1017 = vsyncadd (%p1149_p6), %s318_s10, 4294967040  ;;  %v400_v0 = vlaneseq  ;;  %vm377_vm0 = vcmask 277504   ;;  %v1039_v1 = vmov 0.0   ;;  %v373_v5 = vld [vmem:[%s321_s12] sm:$0xff]  ;;  %s1040_s27 = smov 17   ;;  %v374_v8 = vld [vmem:[%s321_s12 + $0x8] sm:$0xff] }
  0x38   : > { %375 = vst [vmem:[#allocation2] sm:$0xff] %v1039_v1  ;;  %378 = vst.msk [vmem:[#allocation2 + $0x10] sm:$0xff] %vm377_vm0, %v1039_v1  ;;  %v828_v6 = vld [vmem:[%s1321_s2 + $0x1] ss:$2 sm:$0x3]  ;;  %381 = vrot.lane.b32.xlu0 %v373_v5, %s1040_s27  ;;  %s1041_s13 = smov 2  }
  0x39   : > { %v401_v2 = vshrl.u32 %v400_v0, 7  ;;  %v394_v9 = vld [vmem:[%s1321_s2] ss:$2 sm:$0x3]  ;;  %s1042_s15 = smov 16   ;;  %s1043_s20 = smov 18  }
  0x3a   : > { %s1044_s19 = smov 32   ;;  %s1045_s21 = smov 34   ;;  %vm390_vm1 = vcmask 1047688   ;;  %vm385_vm2 = vcmask 138240   ;;  %vm438_vm3 = vcmask 130048   ;;  %vm426_vm4 = vcmask 15360  }
  0x3b   : > { %v402_v3 = vsub.s32 0, %v401_v2  ;;  %v406_v4 = vsub.s32 1, %v401_v2  ;;  %s1046_s22 = smov 111   ;;  %s1047_s23 = smov 127   ;;  %vm450_vm5 = vcmask 146432   ;;  %vm462_vm6 = vcmask 261120  }
  0x3c   : > { %383 = vrot.lane.b32.xlu0 %v374_v8, %s1040_s27  ;;  %s1048_s29 = smov 95   ;;  %s1049_s10 = smov 112   ;;  %v1053_v51 = vmov 0   ;;  %vm490_vm7 = vcmask 1039360   ;;  %vm518_vm8 = vcmask 916480   ;;  %vm504_vm9 = vcmask 1031168  }
  0x3d   : > { %v417_v7 = vrot.slane %v828_v6, %v402_v3  ;;  %v421_v10 = vrot.slane %v828_v6, %v406_v4  ;;  %v1226_v11 = vrot.slane %v394_v9, %v402_v3  ;;  %v1228_v12 = vrot.slane %v394_v9, %v406_v4  ;;  %s1050_s12 = smov 110   ;;  %s1051_s24 = smov 126   ;;  %641 = vmatprep.mubr.bf16.mxu0 %v1053_v51 }
  0x3e   : > { %s1052_s26 = smov 96   ;;  %s1054_s27 = smov 94   ;;  %vm529_vm10 = vcmask 908288   ;;  %vm543_vm11 = vcmask 900096   ;;  %vm568_vm12 = vcmask 777216   ;;  %vm557_vm13 = vcmask 785408  }
  0x3f   : > { %422 = vrot.lane.b32.xlu1 %v417_v7, %s1041_s13  ;;  %vm582_vm14 = vcmask 769024   ;;  %vm602_vm15 = vcmask 1043456   ;;  %p1337_p11 = scmp.ne.s32.totalorder %s1332_s17, 0 }
  0x40   : > { %434 = vrot.lane.b32.xlu0 %v1226_v11, %s1042_s15 }
  0x43   : > { %424 = vrot.lane.b32.xlu1 %v421_v10, %s1041_s13  ;;  %s825_s13 = sshll.u32 %s1211_s25, 3 }
  0x44   : > { %446 = vrot.lane.b32.xlu0 %v417_v7, %s1043_s20 }
  0x47   : > { %436 = vrot.lane.b32.xlu1 %v1228_v12, %s1042_s15  ;;  %s351_s15 = scalar_lea.vmem [#allocation7], %s825_s13 }
  0x48   : > { %458 = vrot.lane.b32.xlu0 %v1226_v11, %s1044_s19 }
  0x4b   : > { %448 = vrot.lane.b32.xlu1 %v421_v10, %s1043_s20  ;;  %s837_s20 = sshll.u32 %s1127_s30, 7 }
  0x4c   : > { %470 = vrot.lane.b32.xlu0 %v417_v7, %s1045_s21 }
  0x4f   : > { %460 = vrot.lane.b32.xlu1 %v1228_v12, %s1044_s19 }
  0x53   : > { %472 = vrot.lane.b32.xlu1 %v421_v10, %s1045_s21 }
  0xaa   : > { %v382_v13 = vpop.permute.xlu0 %381 }
  0xab   : > { %391 = vst.msk [vmem:[#allocation2] sm:$0xff] %vm390_vm1, %v382_v13 }
  0xae   : > { %v384_v15 = vpop.permute.xlu0 %383 }
  0xaf   : > { %v1234_v16 = vsel %vm385_vm2, %v382_v13, %v384_v15  ;;  %393 = vst.msk [vmem:[#allocation2 + $0x10] sm:$0xff] %vm385_vm2, %v384_v15 }
  0xb0   : > { %v411_v61 = vmul.f32 %v1228_v12, %v1234_v16 }
  0xb1   : > { %v423_v14 = vpop.permute.xlu1 %422 }
  0xb2   : > { %v1236_v18 = vld [vmem:[#allocation2] sm:$0xff]  ;;  %v435_v21 = vpop.permute.xlu0 %434 }
  0xb3   : > { %523 = vrot.lane.b32.xlu0 %v1236_v18, %s1046_s22  ;;  %484 = vrot.lane.b32.xlu1 %v1236_v18, %s1047_s23  ;;  %v443_v24 = vmul.f32 %v435_v21, %v1236_v18  ;;  %v431_v31 = vmul.f32 %v423_v14, %v1236_v18  ;;  %v410_v62 = vmul.f32 %v1226_v11, %v1236_v18 }
  0xb5   : > { %v425_v17 = vpop.permute.xlu1 %424 }
  0xb6   : > { %v412_v20 = vld [vmem:[#allocation2 + $0x10] sm:$0xff]  ;;  %v447_v26 = vpop.permute.xlu0 %446  ;;  %v427_v27 = vsel %vm426_vm4, %v423_v14, %v425_v17 }
  0xb7   : > { %v910_v22 = vpack.i.bf16 %v412_v20, %v1234_v16  ;;  %v455_v30 = vmul.f32 %v447_v26, %v1236_v18  ;;  %v433_v32 = vmul.f32 %v425_v17, %v412_v20  ;;  %v432_v35 = vmul.f32 %v427_v27, %v1234_v16 }
  0xb9   : > { %v437_v19 = vpop.permute.xlu1 %436  ;;  %911 = vrot.lane.b32.xlu1 %v910_v22, %s1048_s29  ;;  %901 = vrot.lane.b32.xlu0 %v910_v22, %s1047_s23  ;;  %v915_v40 = vpack.i.bf16 %v433_v32, %v432_v35  ;;  %s693_s23 = sshll.u32 %s351_s15, 4  ;;  %s694_s23 = int_to_ptr.vmem [resolvable:$true] %s693_s23 }
  0xba   : > { %v439_v25 = vsel %vm438_vm3, %v435_v21, %v437_v19  ;;  %v445_v29 = vmul.f32 %v437_v19, %v412_v20  ;;  %v459_v36 = vpop.permute.xlu0 %458 }
  0xbb   : > { %v444_v28 = vmul.f32 %v439_v25, %v1234_v16  ;;  %v467_v44 = vmul.f32 %v459_v36, %v1236_v18 }
  0xbd   : > { %v449_v23 = vpop.permute.xlu1 %448  ;;  %512 = vrot.lane.b32.xlu1 %v443_v24, %s1049_s10  ;;  %906 = vrot.lane.b32.xlu0 %v910_v22, %s1046_s22  ;;  %v920_v37 = vpack.i.bf16 %v445_v29, %v444_v28  ;;  %s1273_s22 = scalar_lea.hbm %s1326_s7, %s837_s20 }
  0xbe   : > { %v451_v33 = vsel %vm450_vm5, %v447_v26, %v449_v23  ;;  %v457_v39 = vmul.f32 %v449_v23, %v412_v20  ;;  %v471_v47 = vpop.permute.xlu0 %470 }
  0xbf   : > { %v456_v38 = vmul.f32 %v451_v33, %v1234_v16  ;;  %v478_v52 = vmul.f32 %v471_v47, %v1236_v18 }
  0xc1   : > { %v461_v34 = vpop.permute.xlu1 %460  ;;  %537 = vrot.lane.b32.xlu1 %v455_v30, %s1050_s12  ;;  %498 = vrot.lane.b32.xlu0 %v431_v31, %s1051_s24  ;;  %v925_v43 = vpack.i.bf16 %v457_v39, %v456_v38 }
  0xc2   : > { %v463_v41 = vsel %vm462_vm6, %v459_v36, %v461_v34  ;;  %v469_v46 = vmul.f32 %v461_v34, %v412_v20 }
  0xc3   : > { %v468_v45 = vmul.f32 %v463_v41, %v1234_v16 }
  0xc5   : > { %921 = vrot.lane.b32.xlu1 %v920_v37, %s1049_s10  ;;  %v473_v42 = vpop.permute.xlu1 %472  ;;  %916 = vrot.lane.b32.xlu0 %v915_v40, %s1051_s24  ;;  %v930_v49 = vpack.i.bf16 %v469_v46, %v468_v45  ;;  %s970_s10 = scalar_lea.vmem %s694_s23, 128 }
  0xc6   : > { %v474_v48 = vsel %vm377_vm0, %v471_v47, %v473_v42  ;;  %v480_v53 = vmul.f32 %v473_v42, %v412_v20  ;;  %vm598_vm0 = vcmask 588800   ;;  %p971_p6 = scmp.ne.s32.totalorder %s694_s23, %s970_s10 }
  0xc7   : > { %v479_v50 = vmul.f32 %v474_v48, %v1234_v16 }
  0xc8   : > { %p972_p12 = pnand %p971_p6, %p1337_p11 }
  0xc9   : > { %926 = vrot.lane.b32.xlu1 %v925_v43, %s1050_s12  ;;  %551 = vrot.lane.b32.xlu0 %v467_v44, %s1052_s26  ;;  %v935_v54 = vpack.i.bf16 %v479_v50, %v478_v52  ;;  %v597_v52 = vld [vmem:[%s1320_s1] sm:$0x3]  ;;  %s1055_s12 = smov [#allocation7]  }
  0xca   : > { %p973_p13 = pneg %p972_p12  ;;  %s974_s24 = sshll.u32 %s1055_s12, 4  ;;  %s975_s24 = int_to_ptr.vmem [resolvable:$false] %s974_s24 }
  0xcb   : > { %p977_p7 = scmp.lt.s32.totalorder %s694_s23, %s975_s24 }
  0xcd   : > { %562 = vrot.lane.b32.xlu1 %v1236_v18, %s1048_s29  ;;  %931 = vrot.lane.b32.xlu0 %v930_v49, %s1052_s26  ;;  %s671_s29 = scalar_lea.sflag [#allocation6], %s1211_s25  ;;  %s976_s26 = scalar_lea.vmem %s975_s24, 256 }
  0xce   : > { %p978_p10 = scmp.lt.s32.totalorder %s976_s26, %s970_s10 }
  0xd0   : > { %p979_p2 = por %p978_p10, %p977_p7 }
  0xd1   : > { %580 = vrot.lane.b32.xlu1 %v480_v53, %s1054_s27  ;;  %936 = vrot.lane.b32.xlu0 %v935_v54, %s1054_s27 }
  0xd2   : > { %p980_p4 = pnand %p979_p2, %p973_p13 }
 0x125   : > { %v485_v55 = vpop.permute.xlu1 %484  ;;  %v524_v56 = vpop.permute.xlu0 %523 }
 0x12b   : > { %v912_v57 = vpop.permute.xlu1 %911  ;;  %v902_v58 = vpop.permute.xlu0 %901 }
 0x12c   : > { %v904_v59 = vunpack.i.h.bf16 %v902_v58  ;;  %v903_v60 = vunpack.i.l.bf16 %v902_v58  ;;  %v914_v29 = vunpack.i.h.bf16 %v912_v57  ;;  %v913_v30 = vunpack.i.l.bf16 %v912_v57 }
 0x12e   : > { %v492_v0 = vsel %vm490_vm7, %v903_v60, %v904_v59  ;;  %v491_v1 = vsel %vm490_vm7, %v485_v55, %v903_v60  ;;  %v570_v39 = vsel %vm568_vm12, %v913_v30, %v914_v29 }
 0x12f   : > { %v513_v63 = vpop.permute.xlu1 %512  ;;  %v907_v2 = vpop.permute.xlu0 %906  ;;  %v588_v3 = vpack.c.bf16 %v492_v0, %v411_v61  ;;  %v587_v4 = vpack.c.bf16 %v491_v1, %v410_v62 }
 0x130   : > { %v909_v14 = vunpack.i.h.bf16 %v907_v2  ;;  %v908_v11 = vunpack.i.l.bf16 %v907_v2 }
 0x131   : > { %609 = vmatprep.subr.bf16.mxu0 %v588_v3 }
 0x132   : > { %610 = vmatpush1.bf16.msra.mxu0 %v587_v4  ;;  %v531_v25 = vsel %vm529_vm10, %v908_v11, %v909_v14  ;;  %v530_v27 = vsel %vm529_vm10, %v524_v56, %v908_v11 }
 0x133   : > { %v538_v5 = vpop.permute.xlu1 %537  ;;  %v499_v6 = vpop.permute.xlu0 %498 }
 0x137   : > { %v922_v7 = vpop.permute.xlu1 %921  ;;  %v917_v10 = vpop.permute.xlu0 %916 }
 0x138   : > { %v924_v8 = vunpack.i.h.bf16 %v922_v7  ;;  %v923_v9 = vunpack.i.l.bf16 %v922_v7  ;;  %v919_v12 = vunpack.i.h.bf16 %v917_v10  ;;  %v918_v13 = vunpack.i.l.bf16 %v917_v10 }
 0x13a   : > { %v520_v15 = vsel %vm518_vm8, %v923_v9, %v924_v8  ;;  %v519_v16 = vsel %vm518_vm8, %v513_v63, %v923_v9  ;;  %v506_v18 = vsel %vm504_vm9, %v918_v13, %v919_v12  ;;  %v505_v19 = vsel %vm504_vm9, %v499_v6, %v918_v13 }
 0x13b   : > { %v927_v17 = vpop.permute.xlu1 %926  ;;  %v552_v22 = vpop.permute.xlu0 %551  ;;  %v590_v23 = vpack.c.bf16 %v520_v15, %v506_v18  ;;  %v589_v24 = vpack.c.bf16 %v519_v16, %v505_v19 }
 0x13c   : > { %v929_v20 = vunpack.i.h.bf16 %v927_v17  ;;  %v928_v21 = vunpack.i.l.bf16 %v927_v17 }
 0x13d   : > { %611 = vmatprep.subr.bf16.mxu0 %v590_v23 }
 0x13e   : > { %v545_v26 = vsel %vm543_vm11, %v928_v21, %v929_v20  ;;  %v544_v28 = vsel %vm543_vm11, %v538_v5, %v928_v21  ;;  %612 = vmatpush1.bf16.msra.mxu0 %v589_v24 }
 0x13f   : > { %v592_v31 = vpack.c.bf16 %v545_v26, %v531_v25  ;;  %v591_v32 = vpack.c.bf16 %v544_v28, %v530_v27  ;;  %v563_v33 = vpop.permute.xlu1 %562  ;;  %v932_v34 = vpop.permute.xlu0 %931 }
 0x140   : > { %v934_v35 = vunpack.i.h.bf16 %v932_v34  ;;  %v933_v36 = vunpack.i.l.bf16 %v932_v34  ;;  %v569_v37 = vsel %vm568_vm12, %v563_v33, %v913_v30 }
 0x141   : > { %613 = vmatprep.subr.bf16.mxu0 %v592_v31 }
 0x142   : > { %614 = vmatpush1.bf16.msra.mxu0 %v591_v32  ;;  %v559_v38 = vsel %vm557_vm13, %v933_v36, %v934_v35  ;;  %v558_v40 = vsel %vm557_vm13, %v552_v22, %v933_v36 }
 0x143   : > { %v937_v41 = vpop.permute.xlu0 %936  ;;  %v594_v42 = vpack.c.bf16 %v570_v39, %v559_v38  ;;  %v593_v43 = vpack.c.bf16 %v569_v37, %v558_v40  ;;  %v581_v46 = vpop.permute.xlu1 %580 }
 0x144   : > { %v939_v44 = vunpack.i.h.bf16 %v937_v41  ;;  %v938_v45 = vunpack.i.l.bf16 %v937_v41 }
 0x145   : > { %615 = vmatprep.subr.bf16.mxu0 %v594_v42 }
 0x146   : > { %v584_v47 = vsel %vm582_vm14, %v939_v44, %v581_v46  ;;  %616 = vmatpush1.bf16.msra.mxu0 %v593_v43  ;;  %v583_v48 = vsel %vm582_vm14, %v938_v45, %v939_v44 }
 0x147   : > { %v596_v49 = vpack.c.bf16 %v584_v47, %v584_v47  ;;  %v595_v50 = vpack.c.bf16 %v583_v48, %v583_v48 }
 0x149   : > { %829 = vmatprep.subr.msk.bf16.mxu0 %vm602_vm15, %v596_v49  ;;  %v604_v51 = vsel %vm602_vm15, %v595_v50, 0 }
 0x14a   : > { %618 = vmatpush1.bf16.msra.mxu0 %v604_v51 }
 0x14d   : > { %830 = vmatmul.mubr.msk.bf16.vlgmr.msra.gmra.mrb[0].mxu0 %vm598_vm0, %v597_v52 }
 0x220   : > { %v643_v53 = vpop.f32.mrb[0].mxu0 }
 0x221   : > { %v662_v54 = vmul.f32 %v643_v53, %v643_v53  ;;  %v645_v55 = vpop.f32.mrb[1].mxu0  ;;  %v655_v56 = vsel %vm602_vm15, %v643_v53, 0.0 }
 0x222   : > { %v652_v57 = vcombine.low %v643_v53, %v645_v55  ;;  %v663_v58 = vmul.f32 %v645_v55, %v645_v55  ;;  %v647_v59 = vpop.f32.mrb[2].mxu0  ;;  %v656_v60 = vsel %vm602_vm15, %v645_v55, 0.0 }
 0x223   : > { %v648_v61 = vpop.f32.mrb[3].mxu0  ;;  %v657_v62 = vadd.f32 %v656_v60, %v655_v56  ;;  %v664_v63 = vsel %vm602_vm15, %v662_v54, 0.0 }
 0x224   : > { %v665_v0 = vsel %vm602_vm15, %v663_v58, 0.0  ;;  %654 = vst [vmem:[%s351_s15] sm:$0xff] %v652_v57 }
 0x225   : > { %658 = vadd.xlane.f32.xlu0 %v657_v62  ;;  %v666_v1 = vadd.f32 %v665_v0, %v664_v63 }
 0x227   : > { %667 = vadd.xlane.f32.xlu1 %v666_v1 }
 0x228   : > { %983 = shalt.err (!%p980_p4)
}
 0x229   : > { %s984_s25 = scalar_lea.hbm %s1273_s22, 128  ;;  %s988_s28 = scalar_lea.hbm %s1326_s7, 256 }
 0x22a   : > { %p985_p5 = scmp.ne.s32.totalorder %s1273_s22, %s984_s25  ;;  %p989_p0 = scmp.lt.u32.totalorder %s1273_s22, %s1326_s7 }
 0x22b   : > { %p990_p1 = scmp.lt.u32.totalorder %s988_s28, %s984_s25  ;;  %p992_p6 = scmp.lt.u32.totalorder %s984_s25, %s1273_s22 }
 0x22c   : > { %p986_p8 = pnand %p985_p5, %p1337_p11 }
 0x22d   : > { %p991_p3 = por %p990_p1, %p989_p0 }
 0x22e   : > { %p987_p9 = pneg %p986_p8 }
 0x22f   : > { %p993_p12 = por %p992_p6, %p991_p3 }
 0x231   : > { %p994_p13 = pnand %p993_p12, %p987_p9 }
 0x233   : > { %997 = shalt.err (!%p994_p13)
}
 0x234   : > { %840 = dma.vmem_to_hbm [thread:$0]  (%p1337_p11), %s694_s23, 128, %s1273_s22, %s671_s29   ;;  %vm660_vm1 = vcmask 3072  }
 0x235   : > { %p364_p7 = scmp.lt.s32.totalorder %s1127_s30, 1 }
 0x237   : > { %s1345_s30 = smov (!%p364_p7, %s1127_s30), 1 }
 0x238   : > { %s826_s20 = sshll.u32 %s1345_s30, 2 }
 0x239   : > { %s367_s10 = scalar_lea.vmem %s1327_s8, %s826_s20  ;;  %s371_s26 = scalar_lea.vmem %s1328_s9, %s826_s20 }
 0x2b2   : > { %v659_v2 = vpop.xlane.xlu0 %658 }
 0x2b3   : > { %661 = vst.msk [vmem:[%s367_s10] sm:$0xf] %vm660_vm1, %v659_v2 }
 0x2b4   : > { %v668_v3 = vpop.xlane.xlu1 %667 }
 0x2b5   : > { %669 = vst.msk [vmem:[%s371_s26] sm:$0xf] %vm660_vm1, %v668_v3 }
 0x2b6 PF: > { %s711_s17 = sand.u32 1, %s1024_s3   ;;  %p1338_p11 = scmp.ne.s32.totalorder %s1333_s18, 0 }
 0x2b7   : > { %p1339_p10 = scmp.ge.s32.totalorder %s1036_s6, 2  ;;  %s712_s30 = scalar_lea.sflag [#allocation6], %s711_s17 }
 0x2b9   : > { %p847_p2 = pnand %p1339_p10, %p1338_p11 }
 0x2bb   : > { %1019 = dma.done.wait (!%p847_p2), %s712_s30, 128  }
 0x2bc   : > { %1021 = vsyncadd (!%p847_p2), %s712_s30, 4294967168  ;;  %p25_p4 = scmp.ge.s32.totalorder %s1131_s11, 4   ;;  %s1340_s3 = smov %s1028_s4 }
 0x2bd   : > { %s1341_s4 = smov %s1032_s5  ;;  %s1342_s5 = smov %s1143_s14 }
 0x2be   : > { %s1343_s6 = smov %s1131_s11  ;;  %27 = sbr.rel (!%p25_p4) target bundleno = 5 (0x5), region = 118 }
 0x2c5   :  { %731 = vsyncpa [#allocation5], 1 }
 0x2c6   :  { %733 = vsyncpa [#allocation5 + $0x1], 1 }
 0x2c7   :  { %734 = vsyncpa [#allocation6], 1 }
 0x2c8   :  { %736 = vsyncpa [#allocation6 + $0x1], 1 }

</bundles_post_ra>
